<compile_context>
chip_gen: v5e
topology: v5e:2x2
jax: 0.10.0
libtpu: 0.0.40
codegen_flags: <defaults>
</compile_context>

<pallas_src>
import functools
import math

import jax
import jax.numpy as jnp
import numpy as np
from jax import lax
from jax.experimental import pallas as pl
from jax.experimental.pallas import tpu as pltpu


def _layer_norm(x, gamma, beta, eps=1e-5):
    # matches torch LayerNorm (fp16-safe subclass computes in float32)
    xf = x.astype(jnp.float32)
    mu = jnp.mean(xf, axis=-1, keepdims=True)
    var = jnp.mean((xf - mu) ** 2, axis=-1, keepdims=True)
    y = (xf - mu) * lax.rsqrt(var + eps)
    return y * gamma + beta


def encoder_layer_kernel(src_ref, pos_ref,
                         wqk_ref, bqk_ref, wv_ref, wo_ref,
                         w1_ref, b1_ref, w2_ref, vec_ref,
                         out_ref, attn_scr,
                         *, nhead, matmul_dtype):
    Nb, S, E = src_ref.shape
    Dh = E // nhead
    R = Nb * S
    scale = 1.0 / math.sqrt(Dh)

    x = src_ref[...].astype(jnp.float32).reshape(R, E)
    pos = pos_ref[...].astype(jnp.float32).reshape(R, E)
    qk_in = x + pos

    def mm(a, w_ref):
        return jnp.dot(a.astype(matmul_dtype), w_ref[...].astype(matmul_dtype),
                       preferred_element_type=jnp.float32)

    # ---- fused Q|K projection (q = k = src + pos); V projected from src ----
    qk = mm(qk_in, wqk_ref) + bqk_ref[...]
    q = qk[:, :E] * scale
    k = qk[:, E:]
    v = mm(x, wv_ref) + vec_ref[0:1, :]           # vec row 0 = bv

    # ---- multi-head attention: small static head loop, batched over Nb ----
    # Head contexts are written directly into a (Nb, S, E) VMEM scratch:
    # no list concat, no explicit kh.T.
    for h in range(nhead):
        lo, hi = h * Dh, (h + 1) * Dh
        qh = q[:, lo:hi].reshape(Nb, S, Dh)
        kh = k[:, lo:hi].reshape(Nb, S, Dh)
        vh = v[:, lo:hi].reshape(Nb, S, Dh)
        s = lax.dot_general(qh.astype(matmul_dtype), kh.astype(matmul_dtype),
                            (((2,), (2,)), ((0,), (0,))),
                            preferred_element_type=jnp.float32)      # (Nb, S, S)
        s = s - jnp.max(s, axis=-1, keepdims=True)
        e = jnp.exp(s)
        p = e * pl.reciprocal(jnp.sum(e, axis=-1, keepdims=True), approx=True)
        ctx = lax.dot_general(p.astype(matmul_dtype), vh.astype(matmul_dtype),
                              (((2,), (1,)), ((0,), (0,))),
                              preferred_element_type=jnp.float32)    # (Nb, S, Dh)
        attn_scr[:, :, lo:hi] = ctx

    attn = mm(attn_scr[...].reshape(R, E), wo_ref) + vec_ref[1:2, :]  # row 1 = bo

    # ---- residual + norm1 (dropout1 identity in eval) ----
    h1 = _layer_norm(x + attn, vec_ref[2:3, :], vec_ref[3:4, :])      # g1, bn1

    # ---- feed-forward (relu, dropout identity) + residual + norm2 ----
    ff = mm(h1, w1_ref) + b1_ref[...]
    ff = jnp.maximum(ff, 0.0)
    ff = mm(ff, w2_ref) + vec_ref[4:5, :]                             # row 4 = b2
    out = _layer_norm(h1 + ff, vec_ref[5:6, :], vec_ref[6:7, :])      # g2, bn2

    out_ref[...] = out.reshape(Nb, S, E).astype(out_ref.dtype)


def _pick_batch_block(N, S, E, F, nhead, target_rows=256, act_budget_bytes=8 << 20):
    """Largest divisor of N whose row count (Nb*S) approaches target_rows while the
    per-block f32 activation footprint stays within a conservative VMEM budget."""
    best = 1
    for d in range(1, N + 1):
        if N % d:
            continue
        rows = d * S
        approx_bytes = 4 * (rows * (8 * E + F) + d * nhead * S * S)
        if d > 1 and approx_bytes > act_budget_bytes:
            break
        best = d
        if rows >= target_rows:
            break
    return best


def transformer_encoder_layer(src, pos, params, *, nhead,
                              batch_block=None, matmul_dtype=jnp.float32):
    """src, pos: (S, N, E) float32; returns (S, N, E). forward_post, eval mode."""
    S, N, E = src.shape
    F = params["w1"].shape[1]

    src_b = jnp.transpose(src, (1, 0, 2))   # (N, S, E) batch-major
    pos_b = jnp.transpose(pos, (1, 0, 2))

    Nb = batch_block if batch_block is not None else _pick_batch_block(N, S, E, F, nhead)
    assert N % Nb == 0, "batch block must divide the batch size"
    grid = (N // Nb,)

    # ---- host-side parameter packing (free) ----
    wqk = jnp.concatenate([params["wq"], params["wk"]], axis=1).astype(matmul_dtype)  # (E, 2E)
    bqk = jnp.concatenate([params["bq"], params["bk"]], axis=1)                       # (1, 2E) f32
    wv = params["wv"].astype(matmul_dtype)
    wo = params["wo"].astype(matmul_dtype)
    w1 = params["w1"].astype(matmul_dtype)
    w2 = params["w2"].astype(matmul_dtype)
    b1 = params["b1"]
    vecE = jnp.concatenate([params["bv"], params["bo"],
                            params["g1"], params["bn1"],
                            params["b2"], params["g2"], params["bn2"]], axis=0)       # (7, E)

    def const2d(shape):
        return pl.BlockSpec(shape, lambda b: (0, 0))

    in_specs = [
        pl.BlockSpec((Nb, S, E), lambda b: (b, 0, 0)),   # src
        pl.BlockSpec((Nb, S, E), lambda b: (b, 0, 0)),   # pos
        const2d((E, 2 * E)),                             # wqk (fused)
        const2d((1, 2 * E)),                             # bqk (fused)
        const2d((E, E)),                                 # wv
        const2d((E, E)),                                 # wo
        const2d((E, F)),                                 # w1
        const2d((1, F)),                                 # b1
        const2d((F, E)),                                 # w2
        const2d((7, E)),                                 # packed bias / LayerNorm vectors
    ]

    # explicit scoped-VMEM budget: pipeline-buffered weights + activation blocks
    # + scratch / temporaries + headroom, clamped to what every TPU gen has.
    itemsize = 4
    weight_bytes = itemsize * (E * 2 * E + 2 * E * E + E * F + F * E + 2 * E + F + 7 * E)
    block_bytes = itemsize * (3 * Nb * S * E)
    temp_bytes = itemsize * (Nb * S * (6 * E + F) + Nb * nhead * S * S)
    est = 2 * (weight_bytes + block_bytes) + 2 * temp_bytes + (1 << 20)
    vmem_limit = int(min(64 * 1024 * 1024, max(16 * 1024 * 1024, est)))

    out = pl.pallas_call(
        functools.partial(encoder_layer_kernel, nhead=nhead, matmul_dtype=matmul_dtype),
        out_shape=jax.ShapeDtypeStruct((N, S, E), src.dtype),
        grid=grid,
        in_specs=in_specs,
        out_specs=pl.BlockSpec((Nb, S, E), lambda b: (b, 0, 0)),
        scratch_shapes=[pltpu.VMEM((Nb, S, E), jnp.float32)],
        compiler_params=pltpu.CompilerParams(
            dimension_semantics=("parallel",),
            vmem_limit_bytes=vmem_limit),
    )(src_b, pos_b, wqk, bqk, wv, wo, w1, b1, w2, vecE)

    return jnp.transpose(out, (1, 0, 2))


def _reference(src, pos, params, *, nhead):
    """Pure-JAX reference mirroring PyTorch forward_post (eval mode)."""
    S, N, E = src.shape
    Dh = E // nhead
    x = src
    qk = x + pos
    q = jnp.einsum("snd,de->sne", qk, params["wq"]) + params["bq"][0]
    k = jnp.einsum("snd,de->sne", qk, params["wk"]) + params["bk"][0]
    v = jnp.einsum("snd,de->sne", x, params["wv"]) + params["bv"][0]
    qh = q.reshape(S, N, nhead, Dh)
    kh = k.reshape(S, N, nhead, Dh)
    vh = v.reshape(S, N, nhead, Dh)
    scores = jnp.einsum("snhd,tnhd->nhst", qh, kh) / math.sqrt(Dh)
    p = jax.nn.softmax(scores, axis=-1)
    ah = jnp.einsum("nhst,tnhd->snhd", p, vh).reshape(S, N, E)
    attn = jnp.einsum("snd,de->sne", ah, params["wo"]) + params["bo"][0]

    def ln(t, g, b):
        mu = jnp.mean(t, axis=-1, keepdims=True)
        var = jnp.mean((t - mu) ** 2, axis=-1, keepdims=True)
        return (t - mu) * lax.rsqrt(var + 1e-5) * g[0] + b[0]

    h1 = ln(x + attn, params["g1"], params["bn1"])
    ff = jnp.maximum(jnp.einsum("snd,df->snf", h1, params["w1"]) + params["b1"][0], 0.0)
    ff = jnp.einsum("snf,fd->snd", ff, params["w2"]) + params["b2"][0]
    return ln(h1 + ff, params["g2"], params["bn2"])


if __name__ == "__main__":
    S, N, E, H, F = 8, 2, 32, 4, 64   # seq, batch, d_model, nhead, dim_feedforward

    key = jax.random.PRNGKey(0)
    keys = jax.random.split(key, 12)

    def rnd(k, shape, scale=0.1):
        return (scale * jax.random.normal(k, shape)).astype(jnp.float32)

    src = rnd(keys[0], (S, N, E), 1.0)
    pos = rnd(keys[1], (S, N, E), 1.0)

    # nn.MultiheadAttention: in_proj_weight (3E, E) split into q/k/v rows; we
    # store transposed (E, E) matrices so the kernel does x @ W.
    params = {
        "wq": rnd(keys[2], (E, E)), "wk": rnd(keys[3], (E, E)), "wv": rnd(keys[4], (E, E)),
        "bq": rnd(keys[5], (1, E)), "bk": rnd(keys[6], (1, E)), "bv": rnd(keys[7], (1, E)),
        "wo": rnd(keys[8], (E, E)), "bo": rnd(keys[9], (1, E)),
        "g1": jnp.ones((1, E), jnp.float32), "bn1": jnp.zeros((1, E), jnp.float32),
        "w1": rnd(keys[10], (E, F)), "b1": jnp.zeros((1, F), jnp.float32),
        "w2": rnd(keys[11], (F, E)), "b2": jnp.zeros((1, E), jnp.float32),
        "g2": jnp.ones((1, E), jnp.float32), "bn2": jnp.zeros((1, E), jnp.float32),
    }

    out = transformer_encoder_layer(src, pos, params, nhead=H)
    out = jax.block_until_ready(out)

    ref = _reference(src, pos, params, nhead=H)
    # loose-ish tolerance: softmax denominator uses the EUP approximate reciprocal
    np.testing.assert_allclose(np.asarray(out), np.asarray(ref), rtol=1e-2, atol=1e-2)

    print("KERNEL_OK")
</pallas_src>

<mosaic_0001>
module attributes {stable_mosaic.version = 11 : i64} {
  func.func @encoder_layer_kernel(%arg0: i32, %arg1: memref<2x8x32xf32, #tpu.memory_space<vmem>>, %arg2: memref<2x8x32xf32, #tpu.memory_space<vmem>>, %arg3: memref<32x64xf32, #tpu.memory_space<vmem>>, %arg4: memref<1x64xf32, #tpu.memory_space<vmem>>, %arg5: memref<32x32xf32, #tpu.memory_space<vmem>>, %arg6: memref<32x32xf32, #tpu.memory_space<vmem>>, %arg7: memref<32x64xf32, #tpu.memory_space<vmem>>, %arg8: memref<1x64xf32, #tpu.memory_space<vmem>>, %arg9: memref<64x32xf32, #tpu.memory_space<vmem>>, %arg10: memref<7x32xf32, #tpu.memory_space<vmem>>, %arg11: memref<2x8x32xf32, #tpu.memory_space<vmem>>, %arg12: memref<2x8x32xf32, #tpu.memory_space<vmem>>) attributes {dimension_semantics = [#tpu.dimension_semantics<parallel>], iteration_bounds = array<i64: 1>, scalar_prefetch = 0 : i64, scratch_operands = 1 : i64, tpu.core_type = #tpu.core_type<tc>, window_params = [{transform_indices = @transform_0, window_bounds = array<i64: 2, 8, 32>}, {transform_indices = @transform_1, window_bounds = array<i64: 2, 8, 32>}, {pipeline_mode = #tpu.pipeline_mode<synchronous>, transform_indices = @transform_2, window_bounds = array<i64: 32, 64>}, {pipeline_mode = #tpu.pipeline_mode<synchronous>, transform_indices = @transform_3, window_bounds = array<i64: 1, 64>}, {pipeline_mode = #tpu.pipeline_mode<synchronous>, transform_indices = @transform_4, window_bounds = array<i64: 32, 32>}, {pipeline_mode = #tpu.pipeline_mode<synchronous>, transform_indices = @transform_5, window_bounds = array<i64: 32, 32>}, {pipeline_mode = #tpu.pipeline_mode<synchronous>, transform_indices = @transform_6, window_bounds = array<i64: 32, 64>}, {pipeline_mode = #tpu.pipeline_mode<synchronous>, transform_indices = @transform_7, window_bounds = array<i64: 1, 64>}, {pipeline_mode = #tpu.pipeline_mode<synchronous>, transform_indices = @transform_8, window_bounds = array<i64: 64, 32>}, {pipeline_mode = #tpu.pipeline_mode<synchronous>, transform_indices = @transform_9, window_bounds = array<i64: 7, 32>}, {transform_indices = @transform_10, window_bounds = array<i64: 2, 8, 32>}]} {
    %c0 = arith.constant 0 : index
    %c0_0 = arith.constant 0 : index
    %c0_1 = arith.constant 0 : index
    %0 = vector.load %arg1[%c0, %c0_0, %c0_1] : memref<2x8x32xf32, #tpu.memory_space<vmem>>, vector<2x8x32xf32>
    %1 = vector.shape_cast %0 : vector<2x8x32xf32> to vector<16x32xf32>
    %c0_2 = arith.constant 0 : index
    %c0_3 = arith.constant 0 : index
    %c0_4 = arith.constant 0 : index
    %2 = vector.load %arg2[%c0_2, %c0_3, %c0_4] : memref<2x8x32xf32, #tpu.memory_space<vmem>>, vector<2x8x32xf32>
    %3 = vector.shape_cast %2 : vector<2x8x32xf32> to vector<16x32xf32>
    %4 = arith.addf %1, %3 : vector<16x32xf32>
    %c0_5 = arith.constant 0 : index
    %c0_6 = arith.constant 0 : index
    %5 = vector.load %arg3[%c0_5, %c0_6] : memref<32x64xf32, #tpu.memory_space<vmem>>, vector<32x64xf32>
    %cst = arith.constant dense<0.000000e+00> : vector<16x64xf32>
    %6 = tpu.matmul %4, %5, %cst {dimension_numbers = #tpu.dot_dimension_numbers<[1], [0], [0], [1], [0, 0, 1, 1], [], []>} : vector<16x32xf32>, vector<32x64xf32>, vector<16x64xf32> -> vector<16x64xf32>
    %c0_7 = arith.constant 0 : index
    %c0_8 = arith.constant 0 : index
    %7 = vector.load %arg4[%c0_7, %c0_8] : memref<1x64xf32, #tpu.memory_space<vmem>>, vector<1x64xf32>
    %8 = vector.broadcast %7 : vector<1x64xf32> to vector<16x64xf32>
    %9 = arith.addf %6, %8 : vector<16x64xf32>
    %10 = vector.extract_strided_slice %9 {offsets = [0, 0], sizes = [16, 32], strides = [1, 1]} : vector<16x64xf32> to vector<16x32xf32>
    %cst_9 = arith.constant 0.353553385 : f32
    %11 = vector.broadcast %cst_9 : f32 to vector<16x32xf32>
    %12 = arith.mulf %10, %11 : vector<16x32xf32>
    %13 = vector.extract_strided_slice %9 {offsets = [0, 32], sizes = [16, 32], strides = [1, 1]} : vector<16x64xf32> to vector<16x32xf32>
    %c0_10 = arith.constant 0 : index
    %c0_11 = arith.constant 0 : index
    %14 = vector.load %arg5[%c0_10, %c0_11] : memref<32x32xf32, #tpu.memory_space<vmem>>, vector<32x32xf32>
    %cst_12 = arith.constant dense<0.000000e+00> : vector<16x32xf32>
    %15 = tpu.matmul %1, %14, %cst_12 {dimension_numbers = #tpu.dot_dimension_numbers<[1], [0], [0], [1], [0, 0, 1, 1], [], []>} : vector<16x32xf32>, vector<32x32xf32>, vector<16x32xf32> -> vector<16x32xf32>
    %c0_13 = arith.constant 0 : index
    %c0_14 = arith.constant 0 : index
    %16 = vector.load %arg10[%c0_13, %c0_14] : memref<7x32xf32, #tpu.memory_space<vmem>>, vector<1x32xf32>
    %17 = vector.broadcast %16 : vector<1x32xf32> to vector<16x32xf32>
    %18 = arith.addf %15, %17 : vector<16x32xf32>
    %19 = vector.extract_strided_slice %12 {offsets = [0, 0], sizes = [16, 8], strides = [1, 1]} : vector<16x32xf32> to vector<16x8xf32>
    %20 = vector.shape_cast %19 : vector<16x8xf32> to vector<2x8x8xf32>
    %21 = vector.extract_strided_slice %13 {offsets = [0, 0], sizes = [16, 8], strides = [1, 1]} : vector<16x32xf32> to vector<16x8xf32>
    %22 = vector.shape_cast %21 : vector<16x8xf32> to vector<2x8x8xf32>
    %23 = vector.extract_strided_slice %18 {offsets = [0, 0], sizes = [16, 8], strides = [1, 1]} : vector<16x32xf32> to vector<16x8xf32>
    %24 = vector.shape_cast %23 : vector<16x8xf32> to vector<2x8x8xf32>
    %cst_15 = arith.constant dense<0.000000e+00> : vector<2x8x8xf32>
    %25 = tpu.matmul %20, %22, %cst_15 {dimension_numbers = #tpu.dot_dimension_numbers<[2], [2], [1], [1], [0, 0, 0, 1, 1, 1], [0], [0]>} : vector<2x8x8xf32>, vector<2x8x8xf32>, vector<2x8x8xf32> -> vector<2x8x8xf32>
    %cst_16 = arith.constant dense<0xFF800000> : vector<2x8xf32>
    %26 = vector.multi_reduction <maximumf>, %25, %cst_16 [2] : vector<2x8x8xf32> to vector<2x8xf32>
    %27 = vector.shape_cast %26 : vector<2x8xf32> to vector<2x8x1xf32>
    %28 = vector.broadcast %27 : vector<2x8x1xf32> to vector<2x8x8xf32>
    %29 = arith.subf %25, %28 : vector<2x8x8xf32>
    %30 = math.exp %29 : vector<2x8x8xf32>
    %cst_17 = arith.constant dense<0.000000e+00> : vector<2x8xf32>
    %31 = vector.multi_reduction <add>, %30, %cst_17 [2] : vector<2x8x8xf32> to vector<2x8xf32>
    %32 = vector.shape_cast %31 : vector<2x8xf32> to vector<2x8x1xf32>
    %33 = tpu.reciprocal %32 {approx = true} : vector<2x8x1xf32> -> vector<2x8x1xf32>
    %34 = vector.broadcast %33 : vector<2x8x1xf32> to vector<2x8x8xf32>
    %35 = arith.mulf %30, %34 : vector<2x8x8xf32>
    %cst_18 = arith.constant dense<0.000000e+00> : vector<2x8x8xf32>
    %36 = tpu.matmul %35, %24, %cst_18 {dimension_numbers = #tpu.dot_dimension_numbers<[2], [1], [1], [2], [0, 0, 0, 1, 1, 2], [0], [0]>} : vector<2x8x8xf32>, vector<2x8x8xf32>, vector<2x8x8xf32> -> vector<2x8x8xf32>
    %c0_19 = arith.constant 0 : index
    %c0_20 = arith.constant 0 : index
    %c0_21 = arith.constant 0 : index
    %37 = vector.load %arg12[%c0_19, %c0_20, %c0_21] : memref<2x8x32xf32, #tpu.memory_space<vmem>>, vector<2x8x8xf32>
    tpu.vector_store %arg12[%c0_19, %c0_20, %c0_21], %36 {strides = array<i32>} : memref<2x8x32xf32, #tpu.memory_space<vmem>>, vector<2x8x8xf32>,
    %38 = vector.extract_strided_slice %12 {offsets = [0, 8], sizes = [16, 8], strides = [1, 1]} : vector<16x32xf32> to vector<16x8xf32>
    %39 = vector.shape_cast %38 : vector<16x8xf32> to vector<2x8x8xf32>
    %40 = vector.extract_strided_slice %13 {offsets = [0, 8], sizes = [16, 8], strides = [1, 1]} : vector<16x32xf32> to vector<16x8xf32>
    %41 = vector.shape_cast %40 : vector<16x8xf32> to vector<2x8x8xf32>
    %42 = vector.extract_strided_slice %18 {offsets = [0, 8], sizes = [16, 8], strides = [1, 1]} : vector<16x32xf32> to vector<16x8xf32>
    %43 = vector.shape_cast %42 : vector<16x8xf32> to vector<2x8x8xf32>
    %cst_22 = arith.constant dense<0.000000e+00> : vector<2x8x8xf32>
    %44 = tpu.matmul %39, %41, %cst_22 {dimension_numbers = #tpu.dot_dimension_numbers<[2], [2], [1], [1], [0, 0, 0, 1, 1, 1], [0], [0]>} : vector<2x8x8xf32>, vector<2x8x8xf32>, vector<2x8x8xf32> -> vector<2x8x8xf32>
    %cst_23 = arith.constant dense<0xFF800000> : vector<2x8xf32>
    %45 = vector.multi_reduction <maximumf>, %44, %cst_23 [2] : vector<2x8x8xf32> to vector<2x8xf32>
    %46 = vector.shape_cast %45 : vector<2x8xf32> to vector<2x8x1xf32>
    %47 = vector.broadcast %46 : vector<2x8x1xf32> to vector<2x8x8xf32>
    %48 = arith.subf %44, %47 : vector<2x8x8xf32>
    %49 = math.exp %48 : vector<2x8x8xf32>
    %cst_24 = arith.constant dense<0.000000e+00> : vector<2x8xf32>
    %50 = vector.multi_reduction <add>, %49, %cst_24 [2] : vector<2x8x8xf32> to vector<2x8xf32>
    %51 = vector.shape_cast %50 : vector<2x8xf32> to vector<2x8x1xf32>
    %52 = tpu.reciprocal %51 {approx = true} : vector<2x8x1xf32> -> vector<2x8x1xf32>
    %53 = vector.broadcast %52 : vector<2x8x1xf32> to vector<2x8x8xf32>
    %54 = arith.mulf %49, %53 : vector<2x8x8xf32>
    %cst_25 = arith.constant dense<0.000000e+00> : vector<2x8x8xf32>
    %55 = tpu.matmul %54, %43, %cst_25 {dimension_numbers = #tpu.dot_dimension_numbers<[2], [1], [1], [2], [0, 0, 0, 1, 1, 2], [0], [0]>} : vector<2x8x8xf32>, vector<2x8x8xf32>, vector<2x8x8xf32> -> vector<2x8x8xf32>
    %c0_26 = arith.constant 0 : index
    %c0_27 = arith.constant 0 : index
    %c8 = arith.constant 8 : index
    %56 = vector.load %arg12[%c0_26, %c0_27, %c8] : memref<2x8x32xf32, #tpu.memory_space<vmem>>, vector<2x8x8xf32>
    tpu.vector_store %arg12[%c0_26, %c0_27, %c8], %55 {strides = array<i32>} : memref<2x8x32xf32, #tpu.memory_space<vmem>>, vector<2x8x8xf32>,
    %57 = vector.extract_strided_slice %12 {offsets = [0, 16], sizes = [16, 8], strides = [1, 1]} : vector<16x32xf32> to vector<16x8xf32>
    %58 = vector.shape_cast %57 : vector<16x8xf32> to vector<2x8x8xf32>
    %59 = vector.extract_strided_slice %13 {offsets = [0, 16], sizes = [16, 8], strides = [1, 1]} : vector<16x32xf32> to vector<16x8xf32>
    %60 = vector.shape_cast %59 : vector<16x8xf32> to vector<2x8x8xf32>
    %61 = vector.extract_strided_slice %18 {offsets = [0, 16], sizes = [16, 8], strides = [1, 1]} : vector<16x32xf32> to vector<16x8xf32>
    %62 = vector.shape_cast %61 : vector<16x8xf32> to vector<2x8x8xf32>
    %cst_28 = arith.constant dense<0.000000e+00> : vector<2x8x8xf32>
    %63 = tpu.matmul %58, %60, %cst_28 {dimension_numbers = #tpu.dot_dimension_numbers<[2], [2], [1], [1], [0, 0, 0, 1, 1, 1], [0], [0]>} : vector<2x8x8xf32>, vector<2x8x8xf32>, vector<2x8x8xf32> -> vector<2x8x8xf32>
    %cst_29 = arith.constant dense<0xFF800000> : vector<2x8xf32>
    %64 = vector.multi_reduction <maximumf>, %63, %cst_29 [2] : vector<2x8x8xf32> to vector<2x8xf32>
    %65 = vector.shape_cast %64 : vector<2x8xf32> to vector<2x8x1xf32>
    %66 = vector.broadcast %65 : vector<2x8x1xf32> to vector<2x8x8xf32>
    %67 = arith.subf %63, %66 : vector<2x8x8xf32>
    %68 = math.exp %67 : vector<2x8x8xf32>
    %cst_30 = arith.constant dense<0.000000e+00> : vector<2x8xf32>
    %69 = vector.multi_reduction <add>, %68, %cst_30 [2] : vector<2x8x8xf32> to vector<2x8xf32>
    %70 = vector.shape_cast %69 : vector<2x8xf32> to vector<2x8x1xf32>
    %71 = tpu.reciprocal %70 {approx = true} : vector<2x8x1xf32> -> vector<2x8x1xf32>
    %72 = vector.broadcast %71 : vector<2x8x1xf32> to vector<2x8x8xf32>
    %73 = arith.mulf %68, %72 : vector<2x8x8xf32>
    %cst_31 = arith.constant dense<0.000000e+00> : vector<2x8x8xf32>
    %74 = tpu.matmul %73, %62, %cst_31 {dimension_numbers = #tpu.dot_dimension_numbers<[2], [1], [1], [2], [0, 0, 0, 1, 1, 2], [0], [0]>} : vector<2x8x8xf32>, vector<2x8x8xf32>, vector<2x8x8xf32> -> vector<2x8x8xf32>
    %c0_32 = arith.constant 0 : index
    %c0_33 = arith.constant 0 : index
    %c16 = arith.constant 16 : index
    %75 = vector.load %arg12[%c0_32, %c0_33, %c16] : memref<2x8x32xf32, #tpu.memory_space<vmem>>, vector<2x8x8xf32>
    tpu.vector_store %arg12[%c0_32, %c0_33, %c16], %74 {strides = array<i32>} : memref<2x8x32xf32, #tpu.memory_space<vmem>>, vector<2x8x8xf32>,
    %76 = vector.extract_strided_slice %12 {offsets = [0, 24], sizes = [16, 8], strides = [1, 1]} : vector<16x32xf32> to vector<16x8xf32>
    %77 = vector.shape_cast %76 : vector<16x8xf32> to vector<2x8x8xf32>
    %78 = vector.extract_strided_slice %13 {offsets = [0, 24], sizes = [16, 8], strides = [1, 1]} : vector<16x32xf32> to vector<16x8xf32>
    %79 = vector.shape_cast %78 : vector<16x8xf32> to vector<2x8x8xf32>
    %80 = vector.extract_strided_slice %18 {offsets = [0, 24], sizes = [16, 8], strides = [1, 1]} : vector<16x32xf32> to vector<16x8xf32>
    %81 = vector.shape_cast %80 : vector<16x8xf32> to vector<2x8x8xf32>
    %cst_34 = arith.constant dense<0.000000e+00> : vector<2x8x8xf32>
    %82 = tpu.matmul %77, %79, %cst_34 {dimension_numbers = #tpu.dot_dimension_numbers<[2], [2], [1], [1], [0, 0, 0, 1, 1, 1], [0], [0]>} : vector<2x8x8xf32>, vector<2x8x8xf32>, vector<2x8x8xf32> -> vector<2x8x8xf32>
    %cst_35 = arith.constant dense<0xFF800000> : vector<2x8xf32>
    %83 = vector.multi_reduction <maximumf>, %82, %cst_35 [2] : vector<2x8x8xf32> to vector<2x8xf32>
    %84 = vector.shape_cast %83 : vector<2x8xf32> to vector<2x8x1xf32>
    %85 = vector.broadcast %84 : vector<2x8x1xf32> to vector<2x8x8xf32>
    %86 = arith.subf %82, %85 : vector<2x8x8xf32>
    %87 = math.exp %86 : vector<2x8x8xf32>
    %cst_36 = arith.constant dense<0.000000e+00> : vector<2x8xf32>
    %88 = vector.multi_reduction <add>, %87, %cst_36 [2] : vector<2x8x8xf32> to vector<2x8xf32>
    %89 = vector.shape_cast %88 : vector<2x8xf32> to vector<2x8x1xf32>
    %90 = tpu.reciprocal %89 {approx = true} : vector<2x8x1xf32> -> vector<2x8x1xf32>
    %91 = vector.broadcast %90 : vector<2x8x1xf32> to vector<2x8x8xf32>
    %92 = arith.mulf %87, %91 : vector<2x8x8xf32>
    %cst_37 = arith.constant dense<0.000000e+00> : vector<2x8x8xf32>
    %93 = tpu.matmul %92, %81, %cst_37 {dimension_numbers = #tpu.dot_dimension_numbers<[2], [1], [1], [2], [0, 0, 0, 1, 1, 2], [0], [0]>} : vector<2x8x8xf32>, vector<2x8x8xf32>, vector<2x8x8xf32> -> vector<2x8x8xf32>
    %c0_38 = arith.constant 0 : index
    %c0_39 = arith.constant 0 : index
    %c24 = arith.constant 24 : index
    %94 = vector.load %arg12[%c0_38, %c0_39, %c24] : memref<2x8x32xf32, #tpu.memory_space<vmem>>, vector<2x8x8xf32>
    tpu.vector_store %arg12[%c0_38, %c0_39, %c24], %93 {strides = array<i32>} : memref<2x8x32xf32, #tpu.memory_space<vmem>>, vector<2x8x8xf32>,
    %c0_40 = arith.constant 0 : index
    %c0_41 = arith.constant 0 : index
    %c0_42 = arith.constant 0 : index
    %95 = vector.load %arg12[%c0_40, %c0_41, %c0_42] : memref<2x8x32xf32, #tpu.memory_space<vmem>>, vector<2x8x32xf32>
    %96 = vector.shape_cast %95 : vector<2x8x32xf32> to vector<16x32xf32>
    %c0_43 = arith.constant 0 : index
    %c0_44 = arith.constant 0 : index
    %97 = vector.load %arg6[%c0_43, %c0_44] : memref<32x32xf32, #tpu.memory_space<vmem>>, vector<32x32xf32>
    %cst_45 = arith.constant dense<0.000000e+00> : vector<16x32xf32>
    %98 = tpu.matmul %96, %97, %cst_45 {dimension_numbers = #tpu.dot_dimension_numbers<[1], [0], [0], [1], [0, 0, 1, 1], [], []>} : vector<16x32xf32>, vector<32x32xf32>, vector<16x32xf32> -> vector<16x32xf32>
    %c1 = arith.constant 1 : index
    %c0_46 = arith.constant 0 : index
    %99 = vector.load %arg10[%c1, %c0_46] : memref<7x32xf32, #tpu.memory_space<vmem>>, vector<1x32xf32>
    %100 = vector.broadcast %99 : vector<1x32xf32> to vector<16x32xf32>
    %101 = arith.addf %98, %100 : vector<16x32xf32>
    %102 = arith.addf %1, %101 : vector<16x32xf32>
    %c2 = arith.constant 2 : index
    %c0_47 = arith.constant 0 : index
    %103 = vector.load %arg10[%c2, %c0_47] : memref<7x32xf32, #tpu.memory_space<vmem>>, vector<1x32xf32>
    %c3 = arith.constant 3 : index
    %c0_48 = arith.constant 0 : index
    %104 = vector.load %arg10[%c3, %c0_48] : memref<7x32xf32, #tpu.memory_space<vmem>>, vector<1x32xf32>
    %cst_49 = arith.constant dense<0.000000e+00> : vector<16xf32>
    %105 = vector.multi_reduction <add>, %102, %cst_49 [1] : vector<16x32xf32> to vector<16xf32>
    %106 = vector.shape_cast %105 : vector<16xf32> to vector<16x1xf32>
    %cst_50 = arith.constant 3.200000e+01 : f32
    %107 = vector.broadcast %cst_50 : f32 to vector<16x1xf32>
    %108 = arith.divf %106, %107 : vector<16x1xf32>
    %109 = vector.broadcast %108 : vector<16x1xf32> to vector<16x32xf32>
    %110 = arith.subf %102, %109 : vector<16x32xf32>
    %111 = arith.mulf %110, %110 : vector<16x32xf32>
    %cst_51 = arith.constant dense<0.000000e+00> : vector<16xf32>
    %112 = vector.multi_reduction <add>, %111, %cst_51 [1] : vector<16x32xf32> to vector<16xf32>
    %113 = vector.shape_cast %112 : vector<16xf32> to vector<16x1xf32>
    %cst_52 = arith.constant 3.200000e+01 : f32
    %114 = vector.broadcast %cst_52 : f32 to vector<16x1xf32>
    %115 = arith.divf %113, %114 : vector<16x1xf32>
    %116 = vector.broadcast %108 : vector<16x1xf32> to vector<16x32xf32>
    %117 = arith.subf %102, %116 : vector<16x32xf32>
    %cst_53 = arith.constant 9.99999974E-6 : f32
    %118 = vector.broadcast %cst_53 : f32 to vector<16x1xf32>
    %119 = arith.addf %115, %118 : vector<16x1xf32>
    %120 = math.rsqrt %119 : vector<16x1xf32>
    %121 = vector.broadcast %120 : vector<16x1xf32> to vector<16x32xf32>
    %122 = arith.mulf %117, %121 : vector<16x32xf32>
    %123 = vector.broadcast %103 : vector<1x32xf32> to vector<16x32xf32>
    %124 = arith.mulf %122, %123 : vector<16x32xf32>
    %125 = vector.broadcast %104 : vector<1x32xf32> to vector<16x32xf32>
    %126 = arith.addf %124, %125 : vector<16x32xf32>
    %c0_54 = arith.constant 0 : index
    %c0_55 = arith.constant 0 : index
    %127 = vector.load %arg7[%c0_54, %c0_55] : memref<32x64xf32, #tpu.memory_space<vmem>>, vector<32x64xf32>
    %cst_56 = arith.constant dense<0.000000e+00> : vector<16x64xf32>
    %128 = tpu.matmul %126, %127, %cst_56 {dimension_numbers = #tpu.dot_dimension_numbers<[1], [0], [0], [1], [0, 0, 1, 1], [], []>} : vector<16x32xf32>, vector<32x64xf32>, vector<16x64xf32> -> vector<16x64xf32>
    %c0_57 = arith.constant 0 : index
    %c0_58 = arith.constant 0 : index
    %129 = vector.load %arg8[%c0_57, %c0_58] : memref<1x64xf32, #tpu.memory_space<vmem>>, vector<1x64xf32>
    %130 = vector.broadcast %129 : vector<1x64xf32> to vector<16x64xf32>
    %131 = arith.addf %128, %130 : vector<16x64xf32>
    %cst_59 = arith.constant 0.000000e+00 : f32
    %132 = vector.broadcast %cst_59 : f32 to vector<16x64xf32>
    %133 = arith.maximumf %131, %132 : vector<16x64xf32>
    %c0_60 = arith.constant 0 : index
    %c0_61 = arith.constant 0 : index
    %134 = vector.load %arg9[%c0_60, %c0_61] : memref<64x32xf32, #tpu.memory_space<vmem>>, vector<64x32xf32>
    %cst_62 = arith.constant dense<0.000000e+00> : vector<16x32xf32>
    %135 = tpu.matmul %133, %134, %cst_62 {dimension_numbers = #tpu.dot_dimension_numbers<[1], [0], [0], [1], [0, 0, 1, 1], [], []>} : vector<16x64xf32>, vector<64x32xf32>, vector<16x32xf32> -> vector<16x32xf32>
    %c4 = arith.constant 4 : index
    %c0_63 = arith.constant 0 : index
    %136 = vector.load %arg10[%c4, %c0_63] : memref<7x32xf32, #tpu.memory_space<vmem>>, vector<1x32xf32>
    %137 = vector.broadcast %136 : vector<1x32xf32> to vector<16x32xf32>
    %138 = arith.addf %135, %137 : vector<16x32xf32>
    %139 = arith.addf %126, %138 : vector<16x32xf32>
    %c5 = arith.constant 5 : index
    %c0_64 = arith.constant 0 : index
    %140 = vector.load %arg10[%c5, %c0_64] : memref<7x32xf32, #tpu.memory_space<vmem>>, vector<1x32xf32>
    %c6 = arith.constant 6 : index
    %c0_65 = arith.constant 0 : index
    %141 = vector.load %arg10[%c6, %c0_65] : memref<7x32xf32, #tpu.memory_space<vmem>>, vector<1x32xf32>
    %cst_66 = arith.constant dense<0.000000e+00> : vector<16xf32>
    %142 = vector.multi_reduction <add>, %139, %cst_66 [1] : vector<16x32xf32> to vector<16xf32>
    %143 = vector.shape_cast %142 : vector<16xf32> to vector<16x1xf32>
    %cst_67 = arith.constant 3.200000e+01 : f32
    %144 = vector.broadcast %cst_67 : f32 to vector<16x1xf32>
    %145 = arith.divf %143, %144 : vector<16x1xf32>
    %146 = vector.broadcast %145 : vector<16x1xf32> to vector<16x32xf32>
    %147 = arith.subf %139, %146 : vector<16x32xf32>
    %148 = arith.mulf %147, %147 : vector<16x32xf32>
    %cst_68 = arith.constant dense<0.000000e+00> : vector<16xf32>
    %149 = vector.multi_reduction <add>, %148, %cst_68 [1] : vector<16x32xf32> to vector<16xf32>
    %150 = vector.shape_cast %149 : vector<16xf32> to vector<16x1xf32>
    %cst_69 = arith.constant 3.200000e+01 : f32
    %151 = vector.broadcast %cst_69 : f32 to vector<16x1xf32>
    %152 = arith.divf %150, %151 : vector<16x1xf32>
    %153 = vector.broadcast %145 : vector<16x1xf32> to vector<16x32xf32>
    %154 = arith.subf %139, %153 : vector<16x32xf32>
    %cst_70 = arith.constant 9.99999974E-6 : f32
    %155 = vector.broadcast %cst_70 : f32 to vector<16x1xf32>
    %156 = arith.addf %152, %155 : vector<16x1xf32>
    %157 = math.rsqrt %156 : vector<16x1xf32>
    %158 = vector.broadcast %157 : vector<16x1xf32> to vector<16x32xf32>
    %159 = arith.mulf %154, %158 : vector<16x32xf32>
    %160 = vector.broadcast %140 : vector<1x32xf32> to vector<16x32xf32>
    %161 = arith.mulf %159, %160 : vector<16x32xf32>
    %162 = vector.broadcast %141 : vector<1x32xf32> to vector<16x32xf32>
    %163 = arith.addf %161, %162 : vector<16x32xf32>
    %164 = vector.shape_cast %163 : vector<16x32xf32> to vector<2x8x32xf32>
    %c0_71 = arith.constant 0 : index
    %c0_72 = arith.constant 0 : index
    %c0_73 = arith.constant 0 : index
    %165 = vector.load %arg11[%c0_71, %c0_72, %c0_73] : memref<2x8x32xf32, #tpu.memory_space<vmem>>, vector<2x8x32xf32>
    tpu.vector_store %arg11[%c0_71, %c0_72, %c0_73], %164 {strides = array<i32>} : memref<2x8x32xf32, #tpu.memory_space<vmem>>, vector<2x8x32xf32>,
    return
  }
  func.func @transform_0(%arg0: i32) -> (i32, i32, i32) {
    %c0_i32 = arith.constant 0 : i32
    %c0_i32_0 = arith.constant 0 : i32
    %c0_i32_1 = arith.constant 0 : i32
    return %arg0, %c0_i32, %c0_i32_0 : i32, i32, i32
  }
  func.func @transform_1(%arg0: i32) -> (i32, i32, i32) {
    %c0_i32 = arith.constant 0 : i32
    %c0_i32_0 = arith.constant 0 : i32
    %c0_i32_1 = arith.constant 0 : i32
    return %arg0, %c0_i32, %c0_i32_0 : i32, i32, i32
  }
  func.func @transform_2(%arg0: i32) -> (i32, i32) {
    %c0_i32 = arith.constant 0 : i32
    %c0_i32_0 = arith.constant 0 : i32
    %c0_i32_1 = arith.constant 0 : i32
    return %c0_i32, %c0_i32_0 : i32, i32
  }
  func.func @transform_3(%arg0: i32) -> (i32, i32) {
    %c0_i32 = arith.constant 0 : i32
    %c0_i32_0 = arith.constant 0 : i32
    %c0_i32_1 = arith.constant 0 : i32
    return %c0_i32, %c0_i32_0 : i32, i32
  }
  func.func @transform_4(%arg0: i32) -> (i32, i32) {
    %c0_i32 = arith.constant 0 : i32
    %c0_i32_0 = arith.constant 0 : i32
    %c0_i32_1 = arith.constant 0 : i32
    return %c0_i32, %c0_i32_0 : i32, i32
  }
  func.func @transform_5(%arg0: i32) -> (i32, i32) {
    %c0_i32 = arith.constant 0 : i32
    %c0_i32_0 = arith.constant 0 : i32
    %c0_i32_1 = arith.constant 0 : i32
    return %c0_i32, %c0_i32_0 : i32, i32
  }
  func.func @transform_6(%arg0: i32) -> (i32, i32) {
    %c0_i32 = arith.constant 0 : i32
    %c0_i32_0 = arith.constant 0 : i32
    %c0_i32_1 = arith.constant 0 : i32
    return %c0_i32, %c0_i32_0 : i32, i32
  }
  func.func @transform_7(%arg0: i32) -> (i32, i32) {
    %c0_i32 = arith.constant 0 : i32
    %c0_i32_0 = arith.constant 0 : i32
    %c0_i32_1 = arith.constant 0 : i32
    return %c0_i32, %c0_i32_0 : i32, i32
  }
  func.func @transform_8(%arg0: i32) -> (i32, i32) {
    %c0_i32 = arith.constant 0 : i32
    %c0_i32_0 = arith.constant 0 : i32
    %c0_i32_1 = arith.constant 0 : i32
    return %c0_i32, %c0_i32_0 : i32, i32
  }
  func.func @transform_9(%arg0: i32) -> (i32, i32) {
    %c0_i32 = arith.constant 0 : i32
    %c0_i32_0 = arith.constant 0 : i32
    %c0_i32_1 = arith.constant 0 : i32
    return %c0_i32, %c0_i32_0 : i32, i32
  }
  func.func @transform_10(%arg0: i32) -> (i32, i32, i32) {
    %c0_i32 = arith.constant 0 : i32
    %c0_i32_0 = arith.constant 0 : i32
    %c0_i32_1 = arith.constant 0 : i32
    return %arg0, %c0_i32, %c0_i32_0 : i32, i32, i32
  }
}

</mosaic_0001>

<bundles_post_ra>
// kernel: tpu_custom_call.1
= control target key start
LH: loop header
LB: loop body
LE: loop exit
PB: predicated region body
PF: predicated region fallthrough
CT: control target
= control target key end

     0   :  { %15 = vsyncpa [#allocation4], 0  ;;  %s1493_s0 = inlined_call_operand.hbm [shape: f32[2,8,32], index: 0, kind: input, shape index: {}]   ;;  %s1494_s1 = inlined_call_operand.hbm [shape: f32[2,8,32], index: 1, kind: input, shape index: {}]   ;;  %s1495_s2 = inlined_call_operand.vmem [shape: f32[32,64], index: 2, kind: input, shape index: {}]   ;;  %s1496_s3 = inlined_call_operand.vmem [shape: f32[1,64], index: 3, kind: input, shape index: {}]   ;;  %s1497_s4 = inlined_call_operand.vmem [shape: f32[32,32], index: 4, kind: input, shape index: {}]   ;;  %s1498_s5 = inlined_call_operand.vmem [shape: f32[32,32], index: 5, kind: input, shape index: {}]   ;;  %s1499_s6 = inlined_call_operand.hbm [shape: f32[32,64], index: 6, kind: input, shape index: {}]   ;;  %s1500_s7 = inlined_call_operand.vmem [shape: f32[1,64], index: 7, kind: input, shape index: {}]   ;;  %s1501_s8 = inlined_call_operand.vmem [shape: f32[64,32], index: 8, kind: input, shape index: {}]   ;;  %s1502_s9 = inlined_call_operand.hbm [shape: f32[7,32], index: 9, kind: input, shape index: {}]   ;;  %s1503_s10 = inlined_call_operand.hbm [shape: f32[2,8,32], index: 10, kind: output, shape index: {}]  }
   0x1   :  { %16 = vsyncpa [#allocation7], 0 }
   0x2   :  { %17 = vsyncpa [#allocation10], 0 }
   0x3   :  { %18 = vsyncpa [#allocation5], 0  ;;  %s36_s15 = sshll.u32 %s1494_s1, 4  ;;  %s1224_s16 = smov [#allocation6]   ;;  %s37_s15 = int_to_ptr.hbm [resolvable:$true] %s36_s15 }
   0x4   :  { %s38_s17 = sshll.u32 %s1224_s16, 4  ;;  %s23_s20 = sshll.u32 %s1493_s0, 4  ;;  %s39_s17 = int_to_ptr.vmem [resolvable:$true] %s38_s17  ;;  %s24_s20 = int_to_ptr.hbm [resolvable:$true] %s23_s20 }
   0x5   :  { %s1225_s21 = smov 128   ;;  %s1226_s22 = smov 8  }
   0x6   :  { %44 = dma.hbm_to_vmem [thread:$0]  %s37_s15, 256, %s39_s17, [#allocation7], %s1225_s21, %s1225_s21, %s1226_s22  }
   0x7   :  { %s1227_s23 = smov [#allocation3]   ;;  %s57_s1 = sshll.u32 %s1499_s6, 4  ;;  %s58_s1 = int_to_ptr.hbm [resolvable:$true] %s57_s1 }
   0x8   :  { %s25_s24 = sshll.u32 %s1227_s23, 4  ;;  %s75_s28 = sshll.u32 %s1502_s9, 4  ;;  %s26_s24 = int_to_ptr.vmem [resolvable:$true] %s25_s24  ;;  %s76_s28 = int_to_ptr.hbm [resolvable:$true] %s75_s28 }
   0x9   :  { %31 = dma.hbm_to_vmem [thread:$0]  %s24_s20, 256, %s26_s24, [#allocation4], %s1225_s21, %s1225_s21, %s1226_s22  }
   0xa   :  { %s1228_s29 = smov [#allocation8]   ;;  %s1229_s11 = smov [#allocation9]  }
   0xb   :  { %s59_s30 = sshll.u32 %s1228_s29, 4  ;;  %s77_s6 = sshll.u32 %s1229_s11, 4  ;;  %s60_s30 = int_to_ptr.vmem [resolvable:$true] %s59_s30  ;;  %s78_s6 = int_to_ptr.vmem [resolvable:$true] %s77_s6 }
   0xc   :  { %65 = dma.hbm_to_vmem [thread:$0]  %s58_s1, 512, %s60_s30, [#allocation7], %s1225_s21, %s1225_s21, %s1226_s22  }
   0xd   :  { %80 = dma.hbm_to_vmem [thread:$0]  %s76_s28, 128, %s78_s6, [#allocation10]  }
   0xe   :  { %1216 = dma.done.wait [#allocation4], 256  }
   0xf   :  { %1217 = vsyncadd [#allocation4], 4294967040 }
  0x10   :  { %1218 = dma.done.wait [#allocation7], 768  }
  0x11   :  { %1219 = vsyncadd [#allocation7], 4294966528 }
  0x12   :  { %1220 = dma.done.wait [#allocation10], 128  }
  0x13   :  { %1221 = vsyncadd [#allocation10], 4294967168  ;;  %v106_v0 = vld [vmem:[%s1495_s2 + $0x18] sm:$0xff]  ;;  %v105_v1 = vld [vmem:[%s1495_s2 + $0x10] sm:$0xff]  ;;  %vm111_vm0 = vcmask 261120   ;;  %s1230_s28 = smov 96  }
  0x14   :  { %130 = vmatpush.msra.mxu1 %v106_v0  ;;  %v1323_v2 = vld [vmem:[#allocation3] sm:$0xff]  ;;  %v99_v3 = vld [vmem:[#allocation6] sm:$0xff]  ;;  %v104_v4 = vld [vmem:[%s1495_s2 + $0x8] sm:$0xff]  ;;  %s1232_s29 = smov 80   ;;  %s1233_s30 = smov 120   ;;  %vm181_vm1 = vcmask 64512  }
  0x15   :  { %v103_v5 = vld [vmem:[%s1495_s2] sm:$0xff]  ;;  %v101_v6 = vadd.f32 %v99_v3, %v1323_v2  ;;  %v146_v7 = vld [vmem:[%s1497_s4 + $0x18] sm:$0xff]  ;;  %v145_v8 = vld [vmem:[%s1497_s4 + $0x10] sm:$0xff]  ;;  %s1234_s11 = smov 112   ;;  %s1236_s6 = smov 72   ;;  %vm445_vm2 = vcmask 130112  }
  0x16   :  { %131 = vmatpush.msra.mxu1 %v105_v1  ;;  %v1339_v9 = vld [vmem:[#allocation3 + $0x8] sm:$0xff]  ;;  %v100_v10 = vld [vmem:[#allocation6 + $0x8] sm:$0xff]  ;;  %v143_v13 = vld [vmem:[%s1497_s4] sm:$0xff]  ;;  %s1237_s12 = smov 16   ;;  %s1238_s9 = smov 24   ;;  %vm586_vm3 = vcmask 195712  }
  0x17   :  { %v144_v11 = vld [vmem:[%s1497_s4 + $0x8] sm:$0xff]  ;;  %v102_v12 = vadd.f32 %v100_v10, %v1339_v9  ;;  %v1045_v14 = vld [vmem:[%s1496_s3] ss:$0 sm:$0xff]  ;;  %s1231_s4 = smov 88   ;;  %s1235_s3 = smov 104   ;;  %vm727_vm4 = vcmask 261312  }
  0x18   :  { %132 = vmatpush.msra.mxu1 %v104_v4  ;;  %v1046_v22 = vld [vmem:[#allocation9] ss:$0 sm:$0xff]  ;;  %vm877_vm12 = vcmask 523264   ;;  %s969_s15 = sshll.u32 %s1503_s10, 4  ;;  %s970_s15 = int_to_ptr.hbm [resolvable:$true] %s969_s15 }
  0x1a   :  { %133 = vmatpush.msra.mxu1 %v103_v5 }
  0x1b   :  { %984 = vmatmul.msk.f32.vlgmr.msra.gmra.mxu1 %vm111_vm0, %v101_v6 }
  0x1c   :  { %167 = vmatpush.msrb.mxu1 %v146_v7 }
  0x1e   :  { %168 = vmatpush.msrb.mxu1 %v145_v8 }
  0x20   :  { %169 = vmatpush.msrb.mxu1 %v144_v11 }
  0x22   :  { %170 = vmatpush.msrb.mxu1 %v143_v13 }
  0x23   :  { %985 = vmatmul.msk.f32.gmra.mxu1 %vm111_vm0, %v102_v12 }
  0x2b   :  { %986 = vmatmul.msk.f32.vlgmr.msrb.gmra.mxu1 %vm111_vm0, %v1323_v2 }
  0x33   :  { %987 = vmatmul.msk.f32.gmra.mxu1 %vm111_vm0, %v1339_v9 }
  0x98   :  { %v135_v15 = vpop.f32.mrf.mxu1 }
  0x99   :  { %v136_v16 = vadd.f32 %v1045_v14, %v135_v15 }
  0x9b   :  { %179 = vrot.lane.b32.xlu0 %v136_v16, %s1230_s28  ;;  %v141_v20 = vmul.f32 0.35355338, %v136_v16 }
  0xa0   :  { %v138_v17 = vpop.f32.mrf.mxu1 }
  0xa1   :  { %v139_v18 = vadd.f32 %v1045_v14, %v138_v17 }
  0xa3   :  { %335 = vrot.lane.b32.xlu2 %v139_v18, %s1231_s4  ;;  %208 = vrot.lane.b32.xlu0 %v139_v18, %s1230_s28  ;;  %v142_v19 = vmul.f32 0.35355338, %v139_v18 }
  0xa8   :  { %v172_v21 = vpop.f32.mrf.mxu1 }
  0xa9   :  { %v1360_v23 = vadd.f32 %v1046_v22, %v172_v21 }
  0xab   :  { %478 = vrot.lane.b32.xlu2 %v139_v18, %s1232_s29  ;;  %307 = vrot.lane.b32.xlu0 %v136_v16, %s1231_s4 }
  0xb0   :  { %v175_v25 = vpop.f32.mrf.mxu1 }
  0xb1   :  { %v1365_v26 = vadd.f32 %v1046_v22, %v175_v25 }
  0xb3   :  { %333 = vrot.lane.b32.xlu0 %v142_v19, %s1233_s30  ;;  %v1035_v12 = vpack.i.bf16 %v1365_v26, %v1360_v23 }
  0xbb   :  { %450 = vrot.lane.b32.xlu0 %v136_v16, %s1232_s29 }
  0xc3   :  { %448 = vrot.lane.b32.xlu0 %v141_v20, %s1234_s11 }
  0xcb   :  { %476 = vrot.lane.b32.xlu0 %v142_v19, %s1234_s11 }
  0xd3   :  { %617 = vrot.lane.b32.xlu0 %v142_v19, %s1235_s3 }
  0xfd   :  { %v336_v28 = vpop.permute.xlu2 %335 }
 0x105   :  { %v479_v44 = vpop.permute.xlu2 %478 }
 0x10d   :  { %v180_v24 = vpop.permute.xlu0 %179 }
 0x10e   :  { %988 = vmatpush.xpose.msk.msra.mxu2 %vm181_vm1, %v180_v24 }
 0x111   :  { %989 = vmatmul.msk.f32.vlgmr.msra.gmra.mxu2 %vm181_vm1, %v141_v20 }
 0x112   :  { %275 = vmatpush.msrb.mxu2 %v1360_v23 }
 0x115   :  { %v209_v27 = vpop.permute.xlu0 %208 }
 0x116   :  { %990 = vmatpush.xpose.msk.msra.mxu3 %vm181_vm1, %v209_v27 }
 0x119   :  { %991 = vmatmul.msk.f32.vlgmr.msra.gmra.mxu3 %vm181_vm1, %v142_v19 }
 0x11a   :  { %298 = vmatpush.msrb.mxu3 %v1365_v26 }
 0x11c   :  { %996 = vmatpush.xpose.msk.msra.mxu3 %vm181_vm1, %v336_v28 }
 0x11d   :  { %v308_v29 = vpop.permute.xlu0 %307 }
 0x11e   :  { %994 = vmatpush.xpose.msk.msra.mxu2 %vm181_vm1, %v308_v29 }
 0x125   :  { %v334_v45 = vpop.permute.xlu0 %333 }
 0x12d   :  { %v451_v51 = vpop.permute.xlu0 %450 }
 0x135   :  { %v449_v55 = vpop.permute.xlu0 %448 }
 0x13d   :  { %v477_v57 = vpop.permute.xlu0 %476 }
 0x145   :  { %v618_v59 = vpop.permute.xlu0 %617 }
 0x194   :  { %v204_v30 = vpop.f32.mrf.mxu2 }
 0x195   :  { %v235_v31 = vsel %vm181_vm1, %v204_v30, -inf }
 0x196   :  { %236 = vmax.xlane.f32.xlu1 %v235_v31 }
 0x19c   :  { %v232_v32 = vpop.f32.mrf.mxu3 }
 0x19d   :  { %v238_v33 = vsel %vm181_vm1, %v232_v32, -inf }
 0x19e   :  { %239 = vmax.xlane.f32.xlu1 %v238_v33 }
 0x1b7   :  { %305 = vrot.lane.b32.xlu1 %v141_v20, %s1233_s30 }
 0x1bf   :  { %591 = vrot.lane.b32.xlu1 %v136_v16, %s1236_s6 }
 0x1c7   :  { %619 = vrot.lane.b32.xlu1 %v139_v18, %s1236_s6 }
 0x209   :  { %v237_v34 = vpop.xlane.xlu1 %236 }
 0x20a   :  { %v241_v35 = vsub.f32 %v204_v30, %v237_v34 }
 0x20c   :  { %v243_v36 = vmul.f32 1.442695, %v241_v35 }
 0x20e   :  { %1054 = vpow2.f32 %v243_v36 }
 0x211   :  { %v240_v37 = vpop.xlane.xlu1 %239 }
 0x212   :  { %v242_v38 = vsub.f32 %v232_v32, %v240_v37 }
 0x214   :  { %v1055_v39 = vpop.eup %1054  ;;  %v245_v40 = vmul.f32 1.442695, %v242_v38 }
 0x215   :  { %v247_v41 = vsel %vm181_vm1, %v1055_v39, 0.0 }
 0x216   :  { %1056 = vpow2.f32 %v245_v40  ;;  %248 = vadd.xlane.f32.xlu2 %v247_v41 }
 0x21c   :  { %v1057_v42 = vpop.eup %1056 }
 0x21d   :  { %v250_v43 = vsel %vm181_vm1, %v1057_v42, 0.0 }
 0x21e   :  { %251 = vadd.xlane.f32.xlu2 %v250_v43 }
 0x229   :  { %v306_v47 = vpop.permute.xlu1 %305 }
 0x231   :  { %v592_v53 = vpop.permute.xlu1 %591 }
 0x236   :  { %589 = vrot.lane.b32.xlu2 %v141_v20, %s1235_s3 }
 0x239   :  { %v620_v56 = vpop.permute.xlu1 %619 }
 0x289   :  { %v249_v46 = vpop.xlane.xlu2 %248 }
 0x28a   :  { %1058 = vrcp.f32 %v249_v46 }
 0x290   :  { %v1059_v48 = vpop.eup %1058 }
 0x291   :  { %v252_v49 = vpop.xlane.xlu2 %251  ;;  %v255_v50 = vmul.f32 %v1059_v48, %v1055_v39 }
 0x292   :  { %1060 = vrcp.f32 %v252_v49 }
 0x293   :  { %992 = vmatmul.msk.f32.vlgmr.msrb.gmra.mxu2 %vm181_vm1, %v255_v50 }
 0x294   :  { %1000 = vmatpush.xpose.msk.msrb.mxu2 %vm181_vm1, %v451_v51 }
 0x298   :  { %v1061_v52 = vpop.eup %1060 }
 0x299   :  { %v256_v54 = vmul.f32 %v1061_v52, %v1057_v42  ;;  %v590_v58 = vpop.permute.xlu2 %589 }
 0x29b   :  { %993 = vmatmul.msk.f32.vlgmr.msrb.gmra.mxu3 %vm181_vm1, %v256_v54  ;;  %995 = vmatmul.msk.f32.vlgmr.msra.gmra.mxu2 %vm181_vm1, %v306_v47 }
 0x29c   :  { %1002 = vmatpush.xpose.msk.msrb.mxu3 %vm181_vm1, %v479_v44  ;;  %1006 = vmatpush.xpose.msk.msra.mxu2 %vm181_vm1, %v592_v53 }
 0x2a3   :  { %997 = vmatmul.msk.f32.vlgmr.msra.gmra.mxu3 %vm181_vm1, %v334_v45  ;;  %1001 = vmatmul.msk.f32.vlgmr.msrb.gmra.mxu2 %vm181_vm1, %v449_v55 }
 0x2a4   :  { %1008 = vmatpush.xpose.msk.msra.mxu3 %vm181_vm1, %v620_v56 }
 0x2ab   :  { %1003 = vmatmul.msk.f32.vlgmr.msrb.gmra.mxu3 %vm181_vm1, %v477_v57  ;;  %1007 = vmatmul.msk.f32.vlgmr.msra.gmra.mxu2 %vm181_vm1, %v590_v58 }
 0x2b3   :  { %1009 = vmatmul.msk.f32.vlgmr.msra.gmra.mxu3 %vm181_vm1, %v618_v59 }
 0x316   :  { %v277_v60 = vpop.f32.mrf.mxu2 }
 0x317   :  { %303 = vst.msk [vmem:[#allocation2] sm:$0xff] %vm181_vm1, %v277_v60 }
 0x31e   :  { %v300_v61 = vpop.f32.mrf.mxu3  ;;  %v330_v62 = vpop.f32.mrf.mxu2 }
 0x31f   :  { %304 = vst.msk [vmem:[#allocation2 + $0x8] sm:$0xff] %vm181_vm1, %v300_v61  ;;  %v361_v63 = vsel %vm181_vm1, %v330_v62, -inf }
 0x320   :  { %362 = vmax.xlane.f32.xlu2 %v361_v63 }
 0x326   :  { %v358_v0 = vpop.f32.mrf.mxu3  ;;  %v473_v1 = vpop.f32.mrf.mxu2 }
 0x327   :  { %v364_v3 = vsel %vm181_vm1, %v358_v0, -inf  ;;  %v504_v4 = vsel %vm181_vm1, %v473_v1, -inf }
 0x328   :  { %365 = vmax.xlane.f32.xlu1 %v364_v3  ;;  %505 = vmax.xlane.f32.xlu0 %v504_v4 }
 0x32e   :  { %v501_v5 = vpop.f32.mrf.mxu3  ;;  %v614_v6 = vpop.f32.mrf.mxu2 }
 0x32f   :  { %v507_v7 = vsel %vm181_vm1, %v501_v5, -inf  ;;  %v645_v8 = vsel %vm181_vm1, %v614_v6, -inf }
 0x330   :  { %508 = vmax.xlane.f32.xlu2 %v507_v7  ;;  %646 = vmax.xlane.f32.xlu1 %v645_v8 }
 0x336   :  { %v642_v10 = vpop.f32.mrf.mxu3 }
 0x337   :  { %v648_v11 = vsel %vm181_vm1, %v642_v10, -inf }
 0x338   :  { %649 = vmax.xlane.f32.xlu2 %v648_v11 }
 0x350   :  { %1036 = vrot.lane.b32.xlu2 %v1035_v12, %s1233_s30 }
 0x358   :  { %667 = vrot.lane.b32.xlu2 %v1360_v23, %s1235_s3 }
 0x393   :  { %v363_v13 = vpop.xlane.xlu2 %362 }
 0x394   :  { %v367_v14 = vsub.f32 %v330_v62, %v363_v13 }
 0x396   :  { %v369_v15 = vmul.f32 1.442695, %v367_v14  ;;  %v735_v14 = vld [vmem:[%s1498_s5 + $0x18] sm:$0xff] }
 0x397   :  { %756 = vmatpush.msrb.mxu2 %v735_v14  ;;  %v1049_v14 = vld [vmem:[#allocation9 + $0x3] ss:$0 sm:$0xff] }
 0x398   :  { %1062 = vpow2.f32 %v369_v15  ;;  %v734_v15 = vld [vmem:[%s1498_s5 + $0x10] sm:$0xff] }
 0x399   :  { %757 = vmatpush.msrb.mxu2 %v734_v15 }
 0x39b   :  { %v506_v16 = vpop.xlane.xlu0 %505  ;;  %v366_v17 = vpop.xlane.xlu1 %365 }
 0x39c   :  { %v510_v18 = vsub.f32 %v473_v1, %v506_v16  ;;  %v368_v19 = vsub.f32 %v358_v0, %v366_v17  ;;  %v733_v16 = vld [vmem:[%s1498_s5 + $0x8] sm:$0xff]  ;;  %v732_v17 = vld [vmem:[%s1498_s5] sm:$0xff] }
 0x39d   :  { %758 = vmatpush.msrb.mxu2 %v733_v16 }
 0x39e   :  { %v1063_v20 = vpop.eup %1062  ;;  %v512_v21 = vmul.f32 1.442695, %v510_v18  ;;  %v371_v22 = vmul.f32 1.442695, %v368_v19 }
 0x39f   :  { %v373_v24 = vsel %vm181_vm1, %v1063_v20, 0.0  ;;  %759 = vmatpush.msrb.mxu2 %v732_v17 }
 0x3a0   :  { %1064 = vpow2.f32 %v512_v21  ;;  %374 = vadd.xlane.f32.xlu0 %v373_v24 }
 0x3a1   :  { %1066 = vpow2.f32 %v371_v22 }
 0x3a3   :  { %v509_v25 = vpop.xlane.xlu2 %508  ;;  %v647_v27 = vpop.xlane.xlu1 %646 }
 0x3a4   :  { %v511_v28 = vsub.f32 %v501_v5, %v509_v25  ;;  %v651_v23 = vsub.f32 %v614_v6, %v647_v27  ;;  %v1047_v27 = vld [vmem:[#allocation9 + $0x1] ss:$0 sm:$0xff] }
 0x3a6   :  { %v1065_v29 = vpop.eup %1064  ;;  %v514_v30 = vmul.f32 1.442695, %v511_v28  ;;  %v653_v31 = vmul.f32 1.442695, %v651_v23 }
 0x3a7   :  { %v1067_v32 = vpop.eup %1066  ;;  %v516_v33 = vsel %vm181_vm1, %v1065_v29, 0.0 }
 0x3a8   :  { %1068 = vpow2.f32 %v514_v30  ;;  %517 = vadd.xlane.f32.xlu0 %v516_v33  ;;  %v376_v34 = vsel %vm181_vm1, %v1067_v32, 0.0 }
 0x3a9   :  { %1070 = vpow2.f32 %v653_v31  ;;  %377 = vadd.xlane.f32.xlu1 %v376_v34 }
 0x3ab   :  { %v650_v35 = vpop.xlane.xlu2 %649 }
 0x3ac   :  { %v652_v36 = vsub.f32 %v642_v10, %v650_v35  ;;  %v1239_v35 = vmov 32.0  }
 0x3ae   :  { %v1069_v37 = vpop.eup %1068  ;;  %v655_v38 = vmul.f32 1.442695, %v652_v36 }
 0x3af   :  { %v1071_v39 = vpop.eup %1070  ;;  %v519_v40 = vsel %vm181_vm1, %v1069_v37, 0.0 }
 0x3b0   :  { %1072 = vpow2.f32 %v655_v38  ;;  %v657_v41 = vsel %vm181_vm1, %v1071_v39, 0.0 }
 0x3b1   :  { %520 = vadd.xlane.f32.xlu1 %v519_v40  ;;  %658 = vadd.xlane.f32.xlu0 %v657_v41 }
 0x3b3   :  { %v1037_v42 = vpop.permute.xlu2 %1036 }
 0x3b4   :  { %v1038_v43 = vunpack.i.l.bf16 %v1037_v42  ;;  %v1039_v44 = vunpack.i.h.bf16 %v1037_v42 }
 0x3b6   :  { %v1073_v45 = vpop.eup %1072  ;;  %405 = vmatpush.msra.mxu0 %v1038_v43 }
 0x3b7   :  { %v660_v46 = vsel %vm181_vm1, %v1073_v45, 0.0 }
 0x3b8   :  { %432 = vmatpush.msrb.mxu0 %v1039_v44 }
 0x3b9   :  { %661 = vadd.xlane.f32.xlu0 %v660_v46 }
 0x3bb   :  { %v668_v0 = vpop.permute.xlu2 %667 }
 0x3ca   :  { %1041 = vrot.lane.b32.xlu1 %v1035_v12, %s1234_s11 }
 0x3cd   :  { %693 = vrot.lane.b32.xlu0 %v1365_v26, %s1235_s3 }
 0x413   :  { %v375_v47 = vpop.xlane.xlu0 %374 }
 0x414   :  { %1074 = vrcp.f32 %v375_v47 }
 0x41a   :  { %v1075_v48 = vpop.eup %1074 }
 0x41b   :  { %v381_v49 = vmul.f32 %v1075_v48, %v1063_v20  ;;  %v518_v52 = vpop.xlane.xlu0 %517 }
 0x41c   :  { %v378_v50 = vpop.xlane.xlu1 %377 }
 0x41d   :  { %1076 = vrcp.f32 %v378_v50  ;;  %998 = vmatmul.msk.f32.vlgmr.msra.gmra.mxu0 %vm181_vm1, %v381_v49  ;;  %v831_v50 = vld [vmem:[#allocation8 + $0x18] sm:$0xff] }
 0x41e   :  { %1078 = vrcp.f32 %v518_v52  ;;  %854 = vmatpush.msrb.mxu3 %v831_v50  ;;  %v829_v52 = vld [vmem:[#allocation8 + $0x8] sm:$0xff] }
 0x423   :  { %v1077_v51 = vpop.eup %1076 }
 0x424   :  { %v382_v53 = vmul.f32 %v1077_v51, %v1067_v32  ;;  %v659_v54 = vpop.xlane.xlu0 %658  ;;  %v521_v55 = vpop.xlane.xlu1 %520  ;;  %v830_v51 = vld [vmem:[#allocation8 + $0x10] sm:$0xff] }
 0x425   :  { %1080 = vrcp.f32 %v521_v55  ;;  %v1079_v57 = vpop.eup %1078  ;;  %855 = vmatpush.msrb.mxu3 %v830_v51 }
 0x426   :  { %999 = vmatmul.msk.f32.vlgmr.msrb.gmra.mxu0 %vm181_vm1, %v382_v53  ;;  %1082 = vrcp.f32 %v659_v54  ;;  %v524_v61 = vmul.f32 %v1079_v57, %v1065_v29  ;;  %v828_v53 = vld [vmem:[#allocation8] sm:$0xff]  ;;  %v874_v57 = vld [vmem:[%s1501_s8 + $0x38] sm:$0xff] }
 0x427   :  { %856 = vmatpush.msrb.mxu3 %v829_v52 }
 0x429   :  { %857 = vmatpush.msrb.mxu3 %v828_v53 }
 0x42b   :  { %v1081_v26 = vpop.eup %1080 }
 0x42c   :  { %v662_v56 = vpop.xlane.xlu0 %661  ;;  %v525_v62 = vmul.f32 %v1081_v26, %v1069_v37  ;;  %v1083_v1 = vpop.eup %1082  ;;  %v873_v26 = vld [vmem:[%s1501_s8 + $0x30] sm:$0xff] }
 0x42d   :  { %1084 = vrcp.f32 %v662_v56  ;;  %v665_v4 = vmul.f32 %v1083_v1, %v1071_v39  ;;  %v870_v1 = vld [vmem:[%s1501_s8 + $0x18] sm:$0xff] }
 0x42e   :  { %1086 = vrcp.f32 %v1239_v35  ;;  %v1051_v35 = vld [vmem:[#allocation9 + $0x4] ss:$0 sm:$0xff] }
 0x433   :  { %v1085_v3 = vpop.eup %1084 }
 0x434   :  { %v666_v5 = vmul.f32 %v1085_v3, %v1073_v45  ;;  %v1087_v36 = vpop.eup %1086 }
 0x435   :  { %v778_v37 = vmul.f32 32.0, %v1087_v36  ;;  %vm782_vm5 = vweird.f32 %v1087_v36 }
 0x437   :  { %v779_v38 = vsub.f32 1.0, %v778_v37 }
 0x439   :  { %v780_v39 = vmul.f32 %v1087_v36, %v779_v38 }
 0x43b   :  { %v781_v40 = vadd.f32 %v1087_v36, %v780_v39 }
 0x43c   :  { %v1042_v58 = vpop.permute.xlu1 %1041 }
 0x43d   :  { %v1044_v59 = vunpack.i.h.bf16 %v1042_v58  ;;  %v1043_v60 = vunpack.i.l.bf16 %v1042_v58  ;;  %v1440_v41 = vsel %vm782_vm5, %v1087_v36, %v781_v40  ;;  %v872_v58 = vld [vmem:[%s1501_s8 + $0x28] sm:$0xff] }
 0x43f   :  { %v694_v63 = vpop.permute.xlu0 %693  ;;  %547 = vmatpush.msra.mxu0 %v1043_v60  ;;  %573 = vmatpush.msra.mxu1 %v1044_v59 }
 0x440   :  { %1004 = vmatmul.msk.f32.vlgmr.msra.gmra.mxu0 %vm181_vm1, %v524_v61  ;;  %1005 = vmatmul.msk.f32.vlgmr.msra.gmra.mxu1 %vm181_vm1, %v525_v62  ;;  %v871_v61 = vld [vmem:[%s1501_s8 + $0x20] sm:$0xff] }
 0x441   :  { %688 = vmatpush.msrb.mxu0 %v668_v0  ;;  %714 = vmatpush.msrb.mxu1 %v694_v63 }
 0x443   :  { %892 = vmatpush.msra.mxu0 %v874_v57 }
 0x445   :  { %893 = vmatpush.msra.mxu0 %v873_v26 }
 0x447   :  { %894 = vmatpush.msra.mxu0 %v872_v58 }
 0x448   :  { %1010 = vmatmul.msk.f32.vlgmr.msrb.gmra.mxu0 %vm181_vm1, %v665_v4  ;;  %1011 = vmatmul.msk.f32.vlgmr.msrb.gmra.mxu1 %vm181_vm1, %v666_v5 }
 0x449   :  { %895 = vmatpush.msra.mxu0 %v871_v61 }
 0x44b   :  { %896 = vmatpush.msra.mxu0 %v870_v1  ;;  %v1052_v1 = vld [vmem:[#allocation9 + $0x5] ss:$0 sm:$0xff] }
 0x49a   :  { %v407_v6 = vpop.f32.mrf.mxu0 }
 0x49b   :  { %439 = vrot.lane.b32.xlu2 %v407_v6, %s1226_s22 }
 0x4a3   :  { %v434_v7 = vpop.f32.mrf.mxu0 }
 0x4bd   :  { %v549_v8 = vpop.f32.mrf.mxu0  ;;  %v575_v10 = vpop.f32.mrf.mxu1 }
 0x4be   :  { %582 = vrot.lane.b32.xlu0 %v575_v10, %s1237_s12  ;;  %580 = vrot.lane.b32.xlu1 %v549_v8, %s1237_s12  ;;  %v1048_v8 = vld [vmem:[#allocation9 + $0x2] ss:$0 sm:$0xff] }
 0x4c5   :  { %v690_v11 = vpop.f32.mrf.mxu0  ;;  %v716_v12 = vpop.f32.mrf.mxu1 }
 0x4c6   :  { %441 = vrot.lane.b32.xlu1 %v434_v7, %s1226_s22  ;;  %721 = vrot.lane.b32.xlu2 %v690_v11, %s1238_s9 }
 0x4ce   :  { %723 = vrot.lane.b32.xlu2 %v716_v12, %s1238_s9 }
 0x4f5   :  { %v440_v13 = vpop.permute.xlu2 %439 }
 0x4f6   :  { %446 = vst.msk [vmem:[#allocation2] sm:$0xff] %vm445_vm2, %v440_v13 }
 0x520   :  { %v722_v18 = vpop.permute.xlu2 %721 }
 0x528   :  { %v724_v24 = vpop.permute.xlu2 %723 }
 0x530   :  { %v581_v19 = vpop.permute.xlu1 %580  ;;  %v583_v21 = vpop.permute.xlu0 %582 }
 0x531   :  { %587 = vst.msk [vmem:[#allocation2] sm:$0xff] %vm586_vm3, %v581_v19 }
 0x532   :  { %728 = vst.msk [vmem:[#allocation2] sm:$0xff] %vm727_vm4, %v722_v18 }
 0x538   :  { %v442_v20 = vpop.permute.xlu1 %441 }
 0x539   :  { %447 = vst.msk [vmem:[#allocation2 + $0x8] sm:$0xff] %vm445_vm2, %v442_v20  ;;  %v730_v22 = vld [vmem:[#allocation2] sm:$0xff] }
 0x53a   :  { %588 = vst.msk [vmem:[#allocation2 + $0x8] sm:$0xff] %vm586_vm3, %v583_v21  ;;  %1012 = vmatmul.msk.f32.vlgmr.msrb.gmra.mxu2 %vm111_vm0, %v730_v22 }
 0x53b   :  { %729 = vst.msk [vmem:[#allocation2 + $0x8] sm:$0xff] %vm727_vm4, %v724_v24 }
 0x542   :  { %v731_v25 = vld [vmem:[#allocation2 + $0x8] sm:$0xff] }
 0x543   :  { %1013 = vmatmul.msk.f32.gmra.mxu2 %vm111_vm0, %v731_v25  ;;  %v869_v25 = vld [vmem:[%s1501_s8 + $0x10] sm:$0xff] }
 0x544   :  { %897 = vmatpush.msra.mxu0 %v869_v25 }
 0x5bd   :  { %v761_v28 = vpop.f32.mrf.mxu2 }
 0x5be   :  { %v762_v23 = vadd.f32 %v1047_v27, %v761_v28  ;;  %v867_v28 = vld [vmem:[%s1501_s8] sm:$0xff] }
 0x5c0   :  { %v767_v29 = vadd.f32 %v762_v23, %v1323_v2  ;;  %v1050_v23 = vld [vmem:[%s1500_s7] ss:$0 sm:$0xff]  ;;  %s1240_s7 = smov [#allocation11]  }
 0x5c2   :  { %v771_v30 = vsel %vm111_vm0, %v767_v29, 0.0 }
 0x5c3   :  { %772 = vadd.xlane.f32.xlu1 %v771_v30 }
 0x5c6   :  { %v764_v31 = vpop.f32.mrf.mxu2 }
 0x5c7   :  { %v765_v32 = vadd.f32 %v1047_v27, %v764_v31  ;;  %v868_v27 = vld [vmem:[%s1501_s8 + $0x8] sm:$0xff]  ;;  %s967_s8 = sshll.u32 %s1240_s7, 4  ;;  %s968_s8 = int_to_ptr.vmem [resolvable:$true] %s967_s8 }
 0x5c8   :  { %898 = vmatpush.msra.mxu0 %v868_v27 }
 0x5c9   :  { %v768_v33 = vadd.f32 %v765_v32, %v1339_v9 }
 0x5ca   :  { %899 = vmatpush.msra.mxu0 %v867_v28 }
 0x5cb   :  { %v774_v34 = vsel %vm111_vm0, %v768_v33, 0.0 }
 0x5cc   :  { %775 = vadd.xlane.f32.xlu0 %v774_v34 }
 0x636   :  { %v773_v2 = vpop.xlane.xlu1 %772 }
 0x637   :  { %v784_v42 = vmul.f32 %v1440_v41, %v773_v2 }
 0x639   :  { %v786_v43 = vsub.f32 %v767_v29, %v784_v42 }
 0x63b   :  { %v788_v44 = vmul.f32 %v786_v43, %v786_v43 }
 0x63d   :  { %v790_v9 = vsel %vm111_vm0, %v788_v44, 0.0 }
 0x63e   :  { %791 = vadd.xlane.f32.xlu2 %v790_v9 }
 0x63f   :  { %v776_v45 = vpop.xlane.xlu0 %775 }
 0x640   :  { %v785_v46 = vmul.f32 %v1440_v41, %v776_v45 }
 0x642   :  { %v787_v47 = vsub.f32 %v768_v33, %v785_v46 }
 0x644   :  { %v789_v48 = vmul.f32 %v787_v47, %v787_v47 }
 0x646   :  { %v793_v49 = vsel %vm111_vm0, %v789_v48, 0.0 }
 0x647   :  { %794 = vadd.xlane.f32.xlu1 %v793_v49 }
 0x6b1   :  { %v792_v54 = vpop.xlane.xlu2 %791 }
 0x6b2   :  { %v796_v55 = vmul.f32 %v792_v54, %v1440_v41 }
 0x6b4   :  { %v798_v56 = vadd.f32 1e-05, %v796_v55 }
 0x6b6   :  { %1088 = vrsqrt.f32 %v798_v56  ;;  %vm806_vm7 = vweird.f32 %v798_v56 }
 0x6ba   :  { %v795_v59 = vpop.xlane.xlu1 %794 }
 0x6bb   :  { %v797_v60 = vmul.f32 %v795_v59, %v1440_v41 }
 0x6bc   :  { %v1089_v62 = vpop.eup %1088 }
 0x6bd   :  { %v801_v63 = vmul.f32 %v1089_v62, %v798_v56  ;;  %v799_v0 = vadd.f32 1e-05, %v797_v60  ;;  %vm807_vm6 = vweird.f32 %v1089_v62 }
 0x6be   :  { %vm808_vm8 = vmor %vm806_vm7, %vm807_vm6 }
 0x6bf   :  { %v802_v3 = vmul.f32 %v1089_v62, %v801_v63  ;;  %1090 = vrsqrt.f32 %v799_v0  ;;  %vm816_vm10 = vweird.f32 %v799_v0 }
 0x6c1   :  { %v803_v4 = vmul.f32 0.5, %v802_v3 }
 0x6c3   :  { %v804_v5 = vsub.f32 1.5, %v803_v4 }
 0x6c5   :  { %v1091_v6 = vpop.eup %1090  ;;  %v805_v7 = vmul.f32 %v1089_v62, %v804_v5 }
 0x6c6   :  { %v811_v10 = vmul.f32 %v1091_v6, %v799_v0  ;;  %vm817_vm9 = vweird.f32 %v1091_v6 }
 0x6c7   :  { %v809_v11 = vsel %vm808_vm8, %v1089_v62, %v805_v7  ;;  %vm818_vm11 = vmor %vm816_vm10, %vm817_vm9  ;;  %v1053_v7 = vld [vmem:[#allocation9 + $0x6] ss:$0 sm:$0xff] }
 0x6c8   :  { %v820_v12 = vmul.f32 %v809_v11, %v786_v43  ;;  %v812_v13 = vmul.f32 %v1091_v6, %v811_v10 }
 0x6ca   :  { %v823_v15 = vmul.f32 %v1048_v8, %v820_v12  ;;  %v813_v16 = vmul.f32 0.5, %v812_v13 }
 0x6cc   :  { %v814_v17 = vsub.f32 1.5, %v813_v16  ;;  %v826_v18 = vadd.f32 %v1049_v14, %v823_v15 }
 0x6ce   :  { %v815_v19 = vmul.f32 %v1091_v6, %v814_v17  ;;  %1014 = vmatmul.msk.f32.vlgmr.msrb.gmra.mxu3 %vm111_vm0, %v826_v18 }
 0x6d0   :  { %v819_v20 = vsel %vm818_vm11, %v1091_v6, %v815_v19 }
 0x6d1   :  { %v821_v21 = vmul.f32 %v819_v20, %v787_v47 }
 0x6d3   :  { %v824_v22 = vmul.f32 %v1048_v8, %v821_v21 }
 0x6d5   :  { %v827_v24 = vadd.f32 %v1049_v14, %v824_v22 }
 0x6d7   :  { %1015 = vmatmul.msk.f32.gmra.mxu3 %vm111_vm0, %v827_v24 }
 0x751   :  { %v859_v29 = vpop.f32.mrf.mxu3 }
 0x752   :  { %v860_v30 = vadd.f32 %v1050_v23, %v859_v29 }
 0x754   :  { %v865_v31 = vmax.f32 %v860_v30, 0.0 }
 0x756   :  { %1016 = vmatmul.msk.f32.vlgmr.msra.gmra.mxu0 %vm877_vm12, %v865_v31 }
 0x75a   :  { %v862_v32 = vpop.f32.mrf.mxu3 }
 0x75b   :  { %v863_v33 = vadd.f32 %v1050_v23, %v862_v32 }
 0x75d   :  { %v866_v34 = vmax.f32 %v863_v33, 0.0 }
 0x75f   :  { %1017 = vmatmul.msk.f32.gmra.mxu0 %vm877_vm12, %v866_v34 }
 0x7d3   :  { %v901_v36 = vpop.f32.mrf.mxu0 }
 0x7d4   :  { %v902_v37 = vadd.f32 %v1051_v35, %v901_v36 }
 0x7d6   :  { %v907_v38 = vadd.f32 %v902_v37, %v826_v18 }
 0x7d8   :  { %v911_v39 = vsel %vm111_vm0, %v907_v38, 0.0 }
 0x7d9   :  { %912 = vadd.xlane.f32.xlu0 %v911_v39 }
 0x7dc   :  { %v904_v40 = vpop.f32.mrf.mxu0 }
 0x7dd   :  { %v905_v2 = vadd.f32 %v1051_v35, %v904_v40 }
 0x7df   :  { %v908_v42 = vadd.f32 %v905_v2, %v827_v24 }
 0x7e1   :  { %v914_v43 = vsel %vm111_vm0, %v908_v42, 0.0 }
 0x7e2   :  { %915 = vadd.xlane.f32.xlu2 %v914_v43 }
 0x84c   :  { %v913_v44 = vpop.xlane.xlu0 %912 }
 0x84d   :  { %v917_v9 = vmul.f32 %v913_v44, %v1440_v41 }
 0x84f   :  { %v919_v45 = vsub.f32 %v907_v38, %v917_v9 }
 0x851   :  { %v921_v46 = vmul.f32 %v919_v45, %v919_v45 }
 0x853   :  { %v923_v47 = vsel %vm111_vm0, %v921_v46, 0.0 }
 0x854   :  { %924 = vadd.xlane.f32.xlu1 %v923_v47 }
 0x855   :  { %v916_v48 = vpop.xlane.xlu2 %915 }
 0x856   :  { %v918_v49 = vmul.f32 %v916_v48, %v1440_v41 }
 0x858   :  { %v920_v50 = vsub.f32 %v908_v42, %v918_v49 }
 0x85a   :  { %v922_v51 = vmul.f32 %v920_v50, %v920_v50 }
 0x85c   :  { %v926_v52 = vsel %vm111_vm0, %v922_v51, 0.0 }
 0x85d   :  { %927 = vadd.xlane.f32.xlu0 %v926_v52 }
 0x8c7   :  { %v925_v53 = vpop.xlane.xlu1 %924 }
 0x8c8   :  { %v929_v54 = vmul.f32 %v925_v53, %v1440_v41 }
 0x8ca   :  { %v931_v55 = vadd.f32 1e-05, %v929_v54 }
 0x8cc   :  { %1092 = vrsqrt.f32 %v931_v55  ;;  %vm939_vm14 = vweird.f32 %v931_v55 }
 0x8d0   :  { %v928_v56 = vpop.xlane.xlu0 %927 }
 0x8d1   :  { %v930_v57 = vmul.f32 %v928_v56, %v1440_v41 }
 0x8d2   :  { %v1093_v26 = vpop.eup %1092 }
 0x8d3   :  { %v934_v58 = vmul.f32 %v1093_v26, %v931_v55  ;;  %v932_v59 = vadd.f32 1e-05, %v930_v57  ;;  %vm940_vm13 = vweird.f32 %v1093_v26 }
 0x8d4   :  { %vm941_vm15 = vmor %vm939_vm14, %vm940_vm13 }
 0x8d5   :  { %v935_v60 = vmul.f32 %v1093_v26, %v934_v58  ;;  %1094 = vrsqrt.f32 %v932_v59  ;;  %vm949_vm2 = vweird.f32 %v932_v59 }
 0x8d7   :  { %v936_v61 = vmul.f32 0.5, %v935_v60 }
 0x8d9   :  { %v937_v62 = vsub.f32 1.5, %v936_v61 }
 0x8db   :  { %v1095_v63 = vpop.eup %1094  ;;  %v938_v0 = vmul.f32 %v1093_v26, %v937_v62 }
 0x8dc   :  { %v944_v3 = vmul.f32 %v1095_v63, %v932_v59  ;;  %vm950_vm1 = vweird.f32 %v1095_v63 }
 0x8dd   :  { %v942_v4 = vsel %vm941_vm15, %v1093_v26, %v938_v0  ;;  %vm951_vm3 = vmor %vm949_vm2, %vm950_vm1 }
 0x8de   :  { %v953_v5 = vmul.f32 %v942_v4, %v919_v45  ;;  %v945_v6 = vmul.f32 %v1095_v63, %v944_v3 }
 0x8e0   :  { %v956_v8 = vmul.f32 %v1052_v1, %v953_v5  ;;  %v946_v41 = vmul.f32 0.5, %v945_v6 }
 0x8e2   :  { %v947_v10 = vsub.f32 1.5, %v946_v41  ;;  %v959_v11 = vadd.f32 %v1053_v7, %v956_v8 }
 0x8e4   :  { %v948_v12 = vmul.f32 %v1095_v63, %v947_v10  ;;  %961 = vst.msk [vmem:[#allocation11] sm:$0xff] %vm111_vm0, %v959_v11 }
 0x8e6   :  { %v952_v13 = vsel %vm951_vm3, %v1095_v63, %v948_v12 }
 0x8e7   :  { %v954_v14 = vmul.f32 %v952_v13, %v920_v50 }
 0x8e9   :  { %v957_v15 = vmul.f32 %v1052_v1, %v954_v14 }
 0x8eb   :  { %v960_v16 = vadd.f32 %v1053_v7, %v957_v15 }
 0x8ed   :  { %962 = vst.msk [vmem:[#allocation11 + $0x8] sm:$0xff] %vm111_vm0, %v960_v16 }
 0x8ee   :  { %975 = dma.vmem_to_hbm [thread:$0]  %s968_s8, 256, %s970_s15, [#allocation5], %s1225_s21, %s1225_s21, %s1226_s22  }
 0x8ef   :  { %1222 = dma.done.wait [#allocation5], 256  }
 0x8f0   :  { %1223 = vsyncadd [#allocation5], 4294967040 }
 0x8f1   :  { %980 = vsyncpa [#allocation4], 1 }
 0x8f2   :  { %981 = vsyncpa [#allocation7], 1 }
 0x8f3   :  { %982 = vsyncpa [#allocation10], 1 }
 0x8f4   :  { %983 = vsyncpa [#allocation5], 1 }

</bundles_post_ra>
